<compile_context>
chip_gen: v6e
topology: v6e:2x2x1
jax: 0.10.0
libtpu: 0.0.40
codegen_flags: <defaults>
</compile_context>

<pallas_src>
import jax
import jax.numpy as jnp
from jax.experimental import pallas as pl
from jax.experimental.pallas import tpu as pltpu

_LANE = 128


def _copy_kernel(x_ref, o_ref):
    # Identity copy of one (block_rows, 128) tile through VMEM.
    o_ref[...] = x_ref[...]


def _resolve_size(size, total):
    """Resolve a torch-style view size (with at most one -1) against `total`."""
    size = list(size)
    neg = [i for i, s in enumerate(size) if s == -1]
    if len(neg) > 1:
        raise ValueError("only one -1 allowed in view size")
    if neg:
        known = 1
        for s in size:
            if s != -1:
                known *= s
        if known == 0 or total % known != 0:
            raise ValueError(f"view size {tuple(size)} incompatible with {total} elements")
        size[neg[0]] = total // known
    prod = 1
    for s in size:
        prod *= s
    if prod != total:
        raise ValueError(f"view size {tuple(size)} incompatible with {total} elements")
    return tuple(size)


def pallas_view(x, size, *, vmem_budget_bytes=2 << 20):
    """Reproduces torch.Tensor.view(size) for a contiguous tensor.

    The element-order-preserving copy runs as a Pallas TPU kernel over large
    (block_rows, 128) tiles of the flattened buffer (~2 MiB per
    double-buffered VMEM buffer).
    """
    total = x.size
    out_size = _resolve_size(size, total)

    # Like torch.view, this assumes a contiguous (row-major) input; JAX
    # arrays produced by normal ops satisfy this.
    if total == 0 or total % _LANE != 0:
        # Ragged-tail / empty case: a view is metadata-only, so the honest
        # fallback is a free reshape (no HBM traffic at all).
        # TODO(synk): add a masked tail kernel if an explicit materializing
        # copy is ever required for non-128-multiple sizes.
        return x.reshape(out_size)

    itemsize = jnp.dtype(x.dtype).itemsize
    rows = total // _LANE
    flat2d = x.reshape(rows, _LANE)  # metadata-only reshape under XLA

    # Dtype-aware sublane packing: 8 rows per vreg for 4-byte, 16 for 2-byte,
    # 32 for 1-byte dtypes.
    sub = max(8, 32 // itemsize)
    # ~2 MiB per buffer; double-buffered in+out => <= 8 MiB scoped VMEM.
    budget_rows = max(sub, vmem_budget_bytes // (_LANE * itemsize))

    if rows <= budget_rows:
        block_rows = rows            # single full-extent block (always legal)
    else:
        block_rows = (budget_rows // sub) * sub
    grid = (pl.cdiv(rows, block_rows),)  # partial last block handled by Pallas

    cost = pl.CostEstimate(
        flops=0,
        transcendentals=0,
        bytes_accessed=2 * total * itemsize,  # read + write of the whole buffer
    )

    out2d = pl.pallas_call(
        _copy_kernel,
        out_shape=jax.ShapeDtypeStruct((rows, _LANE), x.dtype),
        grid_spec=pltpu.PrefetchScalarGridSpec(
            num_scalar_prefetch=0,
            grid=grid,
            in_specs=[pl.BlockSpec((block_rows, _LANE), lambda i: (i, 0))],
            out_specs=pl.BlockSpec((block_rows, _LANE), lambda i: (i, 0)),
        ),
        compiler_params=pltpu.CompilerParams(
            dimension_semantics=("parallel",),  # shards across 2 TCs on v7x
        ),
        cost_estimate=cost,
    )(flat2d)

    return out2d.reshape(out_size)  # metadata-only reshape


if __name__ == "__main__":
    key = jax.random.PRNGKey(0)

    # NCHW input, as a VAE encoder conv stack would produce before View.
    x = jax.random.normal(key, (2, 4, 16, 16), dtype=jnp.float32)

    # Typical VAE usage: View((-1, C*H*W)) flattens conv features per batch.
    size = (-1, 4 * 16 * 16)
    y = jax.block_until_ready(pallas_view(x, size))

    ref = x.reshape(size)
    assert y.shape == ref.shape, (y.shape, ref.shape)
    assert y.dtype == ref.dtype
    assert bool(jnp.array_equal(y, ref))

    # bf16 path, different target shape (exercises dtype-aware sublane tiling).
    xb = jax.random.normal(jax.random.PRNGKey(1), (2, 8, 8, 8), dtype=jnp.bfloat16)
    yb = jax.block_until_ready(pallas_view(xb, (2, -1)))
    assert yb.shape == (2, 8 * 8 * 8)
    assert bool(jnp.array_equal(yb, xb.reshape(2, -1)))

    # Larger input that spans several grid steps (multi-block path).
    xl = jax.random.normal(jax.random.PRNGKey(2), (4, 8, 32, 32), dtype=jnp.float32)
    yl = jax.block_until_ready(pallas_view(xl, (4, -1)))
    assert bool(jnp.array_equal(yl, xl.reshape(4, -1)))

    print("KERNEL_OK")
</pallas_src>

<mosaic_0001>
module attributes {stable_mosaic.version = 11 : i64} {
  func.func @_copy_kernel(%arg0: i32, %arg1: memref<16x128xf32, #tpu.memory_space<vmem>>, %arg2: memref<16x128xf32, #tpu.memory_space<vmem>>) attributes {dimension_semantics = [#tpu.dimension_semantics<parallel>], iteration_bounds = array<i64: 1>, scalar_prefetch = 0 : i64, scratch_operands = 0 : i64, tpu.core_type = #tpu.core_type<tc>, window_params = [{transform_indices = @transform_0, window_bounds = array<i64: 16, 128>}, {transform_indices = @transform_1, window_bounds = array<i64: 16, 128>}]} {
    %c0 = arith.constant 0 : index
    %c0_0 = arith.constant 0 : index
    %0 = vector.load %arg1[%c0, %c0_0] : memref<16x128xf32, #tpu.memory_space<vmem>>, vector<16x128xf32>
    %c0_1 = arith.constant 0 : index
    %c0_2 = arith.constant 0 : index
    %1 = vector.load %arg2[%c0_1, %c0_2] : memref<16x128xf32, #tpu.memory_space<vmem>>, vector<16x128xf32>
    tpu.vector_store %arg2[%c0_1, %c0_2], %0 {strides = array<i32>} : memref<16x128xf32, #tpu.memory_space<vmem>>, vector<16x128xf32>,
    return
  }
  func.func @transform_0(%arg0: i32) -> (i32, i32) {
    %c0_i32 = arith.constant 0 : i32
    %c0_i32_0 = arith.constant 0 : i32
    return %arg0, %c0_i32 : i32, i32
  }
  func.func @transform_1(%arg0: i32) -> (i32, i32) {
    %c0_i32 = arith.constant 0 : i32
    %c0_i32_0 = arith.constant 0 : i32
    return %arg0, %c0_i32 : i32, i32
  }
}

</mosaic_0001>

<bundles_post_ra>
// kernel: tpu_custom_call.1
= control target key start
LH: loop header
LB: loop body
LE: loop exit
PB: predicated region body
PF: predicated region fallthrough
CT: control target
= control target key end

     0   :  { %6 = vsyncpa [#allocation3], 0  ;;  %s112_s0 = inlined_call_operand.hbm [shape: f32[16,128], index: 0, kind: input, shape index: {}]   ;;  %s113_s1 = inlined_call_operand.hbm [shape: f32[16,128], index: 1, kind: output, shape index: {}]  }
   0x1   :  { %7 = vsyncpa [#allocation4], 0  ;;  %s92_s6 = smov [#allocation2]  }
   0x2   :  { %s13_s7 = sshll.u32 %s92_s6, 4  ;;  %s14_s7 = int_to_ptr.vmem [resolvable:$true] %s13_s7 }
   0x3   :  { %s56_s8 = scalar_lea.vmem %s14_s7, 256  ;;  %p61_p1 = scmp.lt.s32.totalorder %s14_s7, %s14_s7 }
   0x4   :  { %p57_p0 = scmp.ne.s32.totalorder %s14_s7, %s56_s8  ;;  %p62_p2 = scmp.lt.s32.totalorder %s56_s8, %s56_s8 }
   0x6   :  { %p63_p3 = por %p62_p2, %p61_p1 }
   0x8   :  { %p64_p4 = pnand %p63_p3, %p57_p0 }
   0xa   :  { %67 = shalt.err (!%p64_p4)
}
   0xb   :  { %s93_s9 = smov 128   ;;  %s94_s10 = smov 8  }
   0xc   :  { %19 = dma.hbm_to_vmem [thread:$0]  %s112_s0, 256, %s14_s7, [#allocation3], %s93_s9, %s93_s9, %s94_s10  }
   0xd   :  { %88 = dma.done.wait [#allocation3], 256  }
   0xe   :  { %89 = vsyncadd [#allocation3], 4294967040  ;;  %s95_s13 = smov [#allocation5]   ;;  %v23_v0 = vld [vmem:[#allocation2] sm:$0xff]  ;;  %v24_v1 = vld [vmem:[#allocation2 + $0x8] sm:$0xff] }
   0xf   :  { %s32_s14 = sshll.u32 %s95_s13, 4  ;;  %25 = vst [vmem:[#allocation5] sm:$0xff] %v23_v0  ;;  %26 = vst [vmem:[#allocation5 + $0x8] sm:$0xff] %v24_v1  ;;  %s33_s14 = int_to_ptr.vmem [resolvable:$true] %s32_s14 }
  0x10   :  { %s68_s15 = scalar_lea.vmem %s33_s14, 256  ;;  %p73_p6 = scmp.lt.s32.totalorder %s33_s14, %s33_s14 }
  0x11   :  { %p69_p5 = scmp.ne.s32.totalorder %s33_s14, %s68_s15  ;;  %p74_p7 = scmp.lt.s32.totalorder %s68_s15, %s68_s15 }
  0x13   :  { %p75_p8 = por %p74_p7, %p73_p6 }
  0x15   :  { %p76_p9 = pnand %p75_p8, %p69_p5 }
  0x17   :  { %79 = shalt.err (!%p76_p9)
}
  0x18   :  { %38 = dma.vmem_to_hbm [thread:$0]  %s33_s14, 256, %s113_s1, [#allocation4], %s93_s9, %s93_s9, %s94_s10  }
  0x19   :  { %90 = dma.done.wait [#allocation4], 256  }
  0x1a   :  { %91 = vsyncadd [#allocation4], 4294967040 }
  0x1b   :  { %42 = vsyncpa [#allocation3], 1 }
  0x1c   :  { %43 = vsyncpa [#allocation4], 1 }

</bundles_post_ra>
